<compile_context>
chip_gen: v7x
topology: tpu7x:2x2x1
jax: 0.10.0
libtpu: 0.0.40
codegen_flags: <defaults>
</compile_context>

<pallas_src>
import jax
import jax.numpy as jnp
from jax import lax
from jax.experimental import pallas as pl
from jax.experimental.pallas import tpu as pltpu

NEG_SLOPE = 0.01   # nn.LeakyReLU default
LN_EPS = 1e-5      # nn.LayerNorm default


def _leaky_relu(x):
    return jnp.where(x >= 0, x, NEG_SLOPE * x)


def _cdiv(a, b):
    return (a + b - 1) // b


def _round_up(n, m):
    return ((n + m - 1) // m) * m


def _residual_block_kernel(x_ref, w1_ref, w2_ref, b1_ref, lnp_ref, o_ref):
    # x_ref : (TILE_B, F)  activation tile (streamed over batch)
    # w1_ref: (F, H) matmul-dtype, w2_ref: (H, F) matmul-dtype (VMEM-resident)
    # b1_ref: (1, H) f32;  lnp_ref: (3, F) f32 packed rows [b2 | gamma | beta]
    x = x_ref[...].astype(jnp.float32)

    b1 = b1_ref[...]              # (1, H)
    b2 = lnp_ref[0:1, :]          # (1, F)
    gamma = lnp_ref[1:2, :]       # (1, F)
    beta = lnp_ref[2:3, :]        # (1, F)

    # Linear(F -> 2F) + LeakyReLU   (MXU: low-precision operands, f32 accumulation)
    h = jnp.dot(x.astype(w1_ref.dtype), w1_ref[...],
                preferred_element_type=jnp.float32) + b1
    h = _leaky_relu(h)
    # TODO(synk): Dropout(0.2) is identity in eval mode; training-mode dropout
    # (pltpu.prng_seed / prng_random_bits masking) is not implemented.

    # Linear(2F -> F) + residual
    out = jnp.dot(h.astype(w2_ref.dtype), w2_ref[...],
                  preferred_element_type=jnp.float32) + b2
    out = out + x

    # LayerNorm over the full (true-width) feature axis, biased variance (PyTorch).
    f = out.shape[-1]
    mean = jnp.sum(out, axis=-1, keepdims=True) * (1.0 / f)
    centered = out - mean
    var = jnp.sum(centered * centered, axis=-1, keepdims=True) * (1.0 / f)
    normed = centered * lax.rsqrt(var + LN_EPS) * gamma + beta

    # Final LeakyReLU
    o_ref[...] = _leaky_relu(normed).astype(o_ref.dtype)


def _vmem_budget_bytes():
    """Generation-aware VMEM cap with headroom (128 MiB physical on v4/v5e/v6e,
    64 MiB on v7x-class parts / unknown)."""
    try:
        kind = jax.devices()[0].device_kind.lower()
    except Exception:
        kind = ""
    if "v4" in kind or "v5" in kind or "v6" in kind:
        return 100 * 1024 * 1024
    return 56 * 1024 * 1024


def _vmem_footprint_bytes(tile_b, f, h, wbytes, obytes):
    """Worst-case resident VMEM estimate using (8,128)-padded layout dims; weights
    assumed double-buffered so the estimate also covers the no-pipeline_mode fallback."""
    fv = _round_up(f, 128)
    hv = _round_up(h, 128)
    act = 2 * tile_b * fv * 4 + 2 * tile_b * fv * obytes      # x in / out tiles, 2-deep
    wts = 2 * 2 * fv * hv * wbytes                            # w1 + w2 (x2 buffers)
    vecs = 2 * 8 * (hv + fv) * 4                              # b1 + [b2, gamma, beta]
    interm = tile_b * hv * 4 + 3 * tile_b * fv * 4            # h + LN temporaries
    return act + wts + vecs + interm


def prepare_residual_block_params(w1, b1, w2, b2, gamma, beta,
                                  matmul_dtype=jnp.bfloat16):
    """One-time parameter prep (hoist out of the per-call path and cache the result):
    weights cast to the MXU operand dtype, small vectors packed into 2-D f32 tiles.
    Weights are stored (in, out) so the kernel computes x @ W directly."""
    w1_c = jnp.asarray(w1).astype(matmul_dtype)                 # (F, H)
    w2_c = jnp.asarray(w2).astype(matmul_dtype)                 # (H, F)
    b1_2d = jnp.asarray(b1, jnp.float32).reshape(1, -1)         # (1, H)
    ln_params = jnp.stack([jnp.asarray(b2, jnp.float32),
                           jnp.asarray(gamma, jnp.float32),
                           jnp.asarray(beta, jnp.float32)])     # (3, F)
    return w1_c, w2_c, b1_2d, ln_params


def residual_block_apply(x, params, *, max_tile_b=512, out_dtype=None):
    w1_c, w2_c, b1_2d, ln_params = params
    orig_shape = x.shape
    F = orig_shape[-1]
    if x.ndim != 2:
        x = x.reshape(-1, F)
    B = x.shape[0]
    H = w1_c.shape[1]
    out_dtype = x.dtype if out_dtype is None else jnp.dtype(out_dtype)

    wbytes = jnp.dtype(w1_c.dtype).itemsize
    obytes = jnp.dtype(out_dtype).itemsize

    # ---- balanced batch tiling --------------------------------------------
    num_tiles = _cdiv(B, max_tile_b)
    if B >= 16:
        num_tiles = max(num_tiles, 2)          # >= 2 tiles: both v7x TCs get work
    tile_b = _round_up(_cdiv(B, num_tiles), 8)

    # Shrink the tile until the resident footprint fits the VMEM budget.
    budget = _vmem_budget_bytes()
    while tile_b > 8 and _vmem_footprint_bytes(tile_b, F, H, wbytes, obytes) > budget:
        tile_b = _round_up(_cdiv(tile_b, 2), 8)
    num_tiles = _cdiv(B, tile_b)               # ragged last tile is clipped by Pallas
    footprint = _vmem_footprint_bytes(tile_b, F, H, wbytes, obytes)
    vmem_limit = int(min(budget, max(32 * 1024 * 1024, 1.5 * footprint)))
    # NOTE: weights stay fully VMEM-resident; very large F/H would need an extra
    # K/N tiling loop (out of scope for this module's typical sizes).

    cost = pl.CostEstimate(
        flops=4 * B * F * H + 10 * B * F,
        transcendentals=B,
        bytes_accessed=(B * F * 4 + B * F * obytes
                        + 2 * F * H * wbytes + (H + 3 * F) * 4),
    )

    def call(weight_mode):
        wkw = {} if weight_mode is None else {"pipeline_mode": weight_mode}
        return pl.pallas_call(
            _residual_block_kernel,
            out_shape=jax.ShapeDtypeStruct((B, F), out_dtype),
            grid=(num_tiles,),
            in_specs=[
                pl.BlockSpec((tile_b, F), lambda i: (i, 0)),      # x: streamed
                pl.BlockSpec((F, H), lambda i: (0, 0), **wkw),    # w1: VMEM-resident
                pl.BlockSpec((H, F), lambda i: (0, 0), **wkw),    # w2: VMEM-resident
                pl.BlockSpec((1, H), lambda i: (0, 0), **wkw),    # b1
                pl.BlockSpec((3, F), lambda i: (0, 0), **wkw),    # b2 / gamma / beta
            ],
            out_specs=pl.BlockSpec((tile_b, F), lambda i: (i, 0)),
            compiler_params=pltpu.CompilerParams(
                dimension_semantics=("parallel",),   # megacore-shard batch tiles
                vmem_limit_bytes=vmem_limit,
            ),
            cost_estimate=cost,
        )(x, w1_c, w2_c, b1_2d, ln_params)

    try:
        # Constant-index weights/params never change across grid steps: single-buffer
        # them to halve their resident VMEM.
        out = call(pl.Buffered(1))
    except Exception:
        # pipeline_mode / Buffered(1) unsupported on this JAX version -> default spec.
        out = call(None)

    if len(orig_shape) != 2:
        out = out.reshape(orig_shape[:-1] + (F,))
    return out


def residual_block(x, w1, b1, w2, b2, gamma, beta, *, matmul_dtype=jnp.bfloat16,
                   max_tile_b=512, out_dtype=None):
    """Convenience wrapper. For repeated calls, hoist prepare_residual_block_params()
    out of the hot path (it re-reads/re-casts the weights) and call
    residual_block_apply() directly."""
    params = prepare_residual_block_params(w1, b1, w2, b2, gamma, beta, matmul_dtype)
    return residual_block_apply(x, params, max_tile_b=max_tile_b, out_dtype=out_dtype)


if __name__ == "__main__":
    key = jax.random.PRNGKey(0)
    B, F = 8, 32          # batch=8, in_features=32
    H = F * 2             # hidden width of the block's first Linear

    k_x, k_w1, k_b1, k_w2, k_b2 = jax.random.split(key, 5)

    x = jax.random.normal(k_x, (B, F), dtype=jnp.float32)

    # Deterministic parameter init (PyTorch-style uniform bounds), stored as (in, out).
    bound1 = 1.0 / (F ** 0.5)
    w1 = jax.random.uniform(k_w1, (F, H), minval=-bound1, maxval=bound1, dtype=jnp.float32)
    b1 = jax.random.uniform(k_b1, (H,), minval=-bound1, maxval=bound1, dtype=jnp.float32)
    bound2 = 1.0 / (H ** 0.5)
    w2 = jax.random.uniform(k_w2, (H, F), minval=-bound2, maxval=bound2, dtype=jnp.float32)
    b2 = jax.random.uniform(k_b2, (F,), minval=-bound2, maxval=bound2, dtype=jnp.float32)

    # LayerNorm default init: weight=1, bias=0
    gamma = jnp.ones((F,), dtype=jnp.float32)
    beta = jnp.zeros((F,), dtype=jnp.float32)

    # Hoisted one-time weight prep (cache this in real use), then apply.
    params = prepare_residual_block_params(w1, b1, w2, b2, gamma, beta)
    out = residual_block_apply(x, params)
    jax.block_until_ready(out)

    # Pure-JAX references: one mirroring the kernel's bf16-operand matmuls (tight
    # tolerance), one full-f32 sanity check (loose tolerance: bf16 MXU operands
    # change results at the ~1e-2 level).
    def ref(xx, dot_dtype):
        hh = jnp.dot(xx.astype(dot_dtype), w1.astype(dot_dtype),
                     preferred_element_type=jnp.float32) + b1
        hh = jnp.where(hh >= 0, hh, NEG_SLOPE * hh)
        oo = jnp.dot(hh.astype(dot_dtype), w2.astype(dot_dtype),
                     preferred_element_type=jnp.float32) + b2 + xx
        mu = oo.mean(-1, keepdims=True)
        var = ((oo - mu) ** 2).mean(-1, keepdims=True)
        oo = (oo - mu) * lax.rsqrt(var + LN_EPS) * gamma + beta
        return jnp.where(oo >= 0, oo, NEG_SLOPE * oo)

    assert jnp.allclose(out, ref(x, jnp.bfloat16), atol=1e-3, rtol=1e-3)
    assert jnp.allclose(out, ref(x, jnp.float32), atol=5e-2, rtol=5e-2)
    print("KERNEL_OK")
</pallas_src>

<mosaic_0001>
module attributes {stable_mosaic.version = 11 : i64} {
  func.func @_residual_block_kernel(%arg0: i32, %arg1: memref<8x32xf32, #tpu.memory_space<vmem>>, %arg2: memref<32x64xbf16, #tpu.memory_space<vmem>>, %arg3: memref<64x32xbf16, #tpu.memory_space<vmem>>, %arg4: memref<1x64xf32, #tpu.memory_space<vmem>>, %arg5: memref<3x32xf32, #tpu.memory_space<vmem>>, %arg6: memref<8x32xf32, #tpu.memory_space<vmem>>) attributes {dimension_semantics = [#tpu.dimension_semantics<parallel>], iteration_bounds = array<i64: 1>, scalar_prefetch = 0 : i64, scratch_operands = 0 : i64, tpu.core_type = #tpu.core_type<tc>, window_params = [{transform_indices = @transform_0, window_bounds = array<i64: 8, 32>}, {pipeline_mode = #tpu.pipeline_mode<synchronous>, transform_indices = @transform_1, window_bounds = array<i64: 32, 64>}, {pipeline_mode = #tpu.pipeline_mode<synchronous>, transform_indices = @transform_2, window_bounds = array<i64: 64, 32>}, {pipeline_mode = #tpu.pipeline_mode<synchronous>, transform_indices = @transform_3, window_bounds = array<i64: 1, 64>}, {pipeline_mode = #tpu.pipeline_mode<synchronous>, transform_indices = @transform_4, window_bounds = array<i64: 3, 32>}, {transform_indices = @transform_5, window_bounds = array<i64: 8, 32>}]} {
    %c0 = arith.constant 0 : index
    %c0_0 = arith.constant 0 : index
    %0 = vector.load %arg1[%c0, %c0_0] : memref<8x32xf32, #tpu.memory_space<vmem>>, vector<8x32xf32>
    %c0_1 = arith.constant 0 : index
    %c0_2 = arith.constant 0 : index
    %1 = vector.load %arg4[%c0_1, %c0_2] : memref<1x64xf32, #tpu.memory_space<vmem>>, vector<1x64xf32>
    %c0_3 = arith.constant 0 : index
    %c0_4 = arith.constant 0 : index
    %2 = vector.load %arg5[%c0_3, %c0_4] : memref<3x32xf32, #tpu.memory_space<vmem>>, vector<1x32xf32>
    %c1 = arith.constant 1 : index
    %c0_5 = arith.constant 0 : index
    %3 = vector.load %arg5[%c1, %c0_5] : memref<3x32xf32, #tpu.memory_space<vmem>>, vector<1x32xf32>
    %c2 = arith.constant 2 : index
    %c0_6 = arith.constant 0 : index
    %4 = vector.load %arg5[%c2, %c0_6] : memref<3x32xf32, #tpu.memory_space<vmem>>, vector<1x32xf32>
    %5 = arith.truncf %0 : vector<8x32xf32> to vector<8x32xbf16>
    %c0_7 = arith.constant 0 : index
    %c0_8 = arith.constant 0 : index
    %6 = vector.load %arg2[%c0_7, %c0_8] : memref<32x64xbf16, #tpu.memory_space<vmem>>, vector<32x64xbf16>
    %cst = arith.constant dense<0.000000e+00> : vector<8x64xf32>
    %7 = tpu.matmul %5, %6, %cst {dimension_numbers = #tpu.dot_dimension_numbers<[1], [0], [0], [1], [0, 0, 1, 1], [], []>} : vector<8x32xbf16>, vector<32x64xbf16>, vector<8x64xf32> -> vector<8x64xf32>
    %8 = vector.broadcast %1 : vector<1x64xf32> to vector<8x64xf32>
    %9 = arith.addf %7, %8 : vector<8x64xf32>
    %cst_9 = arith.constant 0.000000e+00 : f32
    %10 = vector.broadcast %cst_9 : f32 to vector<8x64xf32>
    %11 = arith.cmpf oge, %9, %10 : vector<8x64xf32>
    %cst_10 = arith.constant 0.00999999977 : f32
    %12 = vector.broadcast %cst_10 : f32 to vector<8x64xf32>
    %13 = arith.mulf %12, %9 : vector<8x64xf32>
    %14 = arith.select %11, %9, %13 : vector<8x64xi1>, vector<8x64xf32>
    %15 = arith.truncf %14 : vector<8x64xf32> to vector<8x64xbf16>
    %c0_11 = arith.constant 0 : index
    %c0_12 = arith.constant 0 : index
    %16 = vector.load %arg3[%c0_11, %c0_12] : memref<64x32xbf16, #tpu.memory_space<vmem>>, vector<64x32xbf16>
    %cst_13 = arith.constant dense<0.000000e+00> : vector<8x32xf32>
    %17 = tpu.matmul %15, %16, %cst_13 {dimension_numbers = #tpu.dot_dimension_numbers<[1], [0], [0], [1], [0, 0, 1, 1], [], []>} : vector<8x64xbf16>, vector<64x32xbf16>, vector<8x32xf32> -> vector<8x32xf32>
    %18 = vector.broadcast %2 : vector<1x32xf32> to vector<8x32xf32>
    %19 = arith.addf %17, %18 : vector<8x32xf32>
    %20 = arith.addf %19, %0 : vector<8x32xf32>
    %cst_14 = arith.constant dense<0.000000e+00> : vector<8xf32>
    %21 = vector.multi_reduction <add>, %20, %cst_14 [1] : vector<8x32xf32> to vector<8xf32>
    %22 = vector.shape_cast %21 : vector<8xf32> to vector<8x1xf32>
    %cst_15 = arith.constant 3.125000e-02 : f32
    %23 = vector.broadcast %cst_15 : f32 to vector<8x1xf32>
    %24 = arith.mulf %22, %23 : vector<8x1xf32>
    %25 = vector.broadcast %24 : vector<8x1xf32> to vector<8x32xf32>
    %26 = arith.subf %20, %25 : vector<8x32xf32>
    %27 = arith.mulf %26, %26 : vector<8x32xf32>
    %cst_16 = arith.constant dense<0.000000e+00> : vector<8xf32>
    %28 = vector.multi_reduction <add>, %27, %cst_16 [1] : vector<8x32xf32> to vector<8xf32>
    %29 = vector.shape_cast %28 : vector<8xf32> to vector<8x1xf32>
    %cst_17 = arith.constant 3.125000e-02 : f32
    %30 = vector.broadcast %cst_17 : f32 to vector<8x1xf32>
    %31 = arith.mulf %29, %30 : vector<8x1xf32>
    %cst_18 = arith.constant 9.99999974E-6 : f32
    %32 = vector.broadcast %cst_18 : f32 to vector<8x1xf32>
    %33 = arith.addf %31, %32 : vector<8x1xf32>
    %34 = math.rsqrt %33 : vector<8x1xf32>
    %35 = vector.broadcast %34 : vector<8x1xf32> to vector<8x32xf32>
    %36 = arith.mulf %26, %35 : vector<8x32xf32>
    %37 = vector.broadcast %3 : vector<1x32xf32> to vector<8x32xf32>
    %38 = arith.mulf %36, %37 : vector<8x32xf32>
    %39 = vector.broadcast %4 : vector<1x32xf32> to vector<8x32xf32>
    %40 = arith.addf %38, %39 : vector<8x32xf32>
    %cst_19 = arith.constant 0.000000e+00 : f32
    %41 = vector.broadcast %cst_19 : f32 to vector<8x32xf32>
    %42 = arith.cmpf oge, %40, %41 : vector<8x32xf32>
    %cst_20 = arith.constant 0.00999999977 : f32
    %43 = vector.broadcast %cst_20 : f32 to vector<8x32xf32>
    %44 = arith.mulf %43, %40 : vector<8x32xf32>
    %45 = arith.select %42, %40, %44 : vector<8x32xi1>, vector<8x32xf32>
    %c0_21 = arith.constant 0 : index
    %c0_22 = arith.constant 0 : index
    %46 = vector.load %arg6[%c0_21, %c0_22] : memref<8x32xf32, #tpu.memory_space<vmem>>, vector<8x32xf32>
    tpu.vector_store %arg6[%c0_21, %c0_22], %45 {strides = array<i32>} : memref<8x32xf32, #tpu.memory_space<vmem>>, vector<8x32xf32>,
    return
  }
  func.func @transform_0(%arg0: i32) -> (i32, i32) {
    %c0_i32 = arith.constant 0 : i32
    %c0_i32_0 = arith.constant 0 : i32
    return %arg0, %c0_i32 : i32, i32
  }
  func.func @transform_1(%arg0: i32) -> (i32, i32) {
    %c0_i32 = arith.constant 0 : i32
    %c0_i32_0 = arith.constant 0 : i32
    %c0_i32_1 = arith.constant 0 : i32
    return %c0_i32, %c0_i32_0 : i32, i32
  }
  func.func @transform_2(%arg0: i32) -> (i32, i32) {
    %c0_i32 = arith.constant 0 : i32
    %c0_i32_0 = arith.constant 0 : i32
    %c0_i32_1 = arith.constant 0 : i32
    return %c0_i32, %c0_i32_0 : i32, i32
  }
  func.func @transform_3(%arg0: i32) -> (i32, i32) {
    %c0_i32 = arith.constant 0 : i32
    %c0_i32_0 = arith.constant 0 : i32
    %c0_i32_1 = arith.constant 0 : i32
    return %c0_i32, %c0_i32_0 : i32, i32
  }
  func.func @transform_4(%arg0: i32) -> (i32, i32) {
    %c0_i32 = arith.constant 0 : i32
    %c0_i32_0 = arith.constant 0 : i32
    %c0_i32_1 = arith.constant 0 : i32
    return %c0_i32, %c0_i32_0 : i32, i32
  }
  func.func @transform_5(%arg0: i32) -> (i32, i32) {
    %c0_i32 = arith.constant 0 : i32
    %c0_i32_0 = arith.constant 0 : i32
    return %arg0, %c0_i32 : i32, i32
  }
}

module attributes {stable_mosaic.version = 11 : i64} {
  func.func @_residual_block_kernel(%arg0: i32, %arg1: memref<8x32xf32, #tpu.memory_space<vmem>>, %arg2: memref<32x64xbf16, #tpu.memory_space<vmem>>, %arg3: memref<64x32xbf16, #tpu.memory_space<vmem>>, %arg4: memref<1x64xf32, #tpu.memory_space<vmem>>, %arg5: memref<3x32xf32, #tpu.memory_space<vmem>>, %arg6: memref<8x32xf32, #tpu.memory_space<vmem>>) attributes {dimension_semantics = [#tpu.dimension_semantics<parallel>], iteration_bounds = array<i64: 1>, scalar_prefetch = 0 : i64, scratch_operands = 0 : i64, tpu.core_type = #tpu.core_type<tc>, window_params = [{transform_indices = @transform_0, window_bounds = array<i64: 8, 32>}, {pipeline_mode = #tpu.pipeline_mode<synchronous>, transform_indices = @transform_1, window_bounds = array<i64: 32, 64>}, {pipeline_mode = #tpu.pipeline_mode<synchronous>, transform_indices = @transform_2, window_bounds = array<i64: 64, 32>}, {pipeline_mode = #tpu.pipeline_mode<synchronous>, transform_indices = @transform_3, window_bounds = array<i64: 1, 64>}, {pipeline_mode = #tpu.pipeline_mode<synchronous>, transform_indices = @transform_4, window_bounds = array<i64: 3, 32>}, {transform_indices = @transform_5, window_bounds = array<i64: 8, 32>}]} {
    %c0 = arith.constant 0 : index
    %c0_0 = arith.constant 0 : index
    %0 = vector.load %arg1[%c0, %c0_0] : memref<8x32xf32, #tpu.memory_space<vmem>>, vector<8x32xf32>
    %c0_1 = arith.constant 0 : index
    %c0_2 = arith.constant 0 : index
    %1 = vector.load %arg4[%c0_1, %c0_2] : memref<1x64xf32, #tpu.memory_space<vmem>>, vector<1x64xf32>
    %c0_3 = arith.constant 0 : index
    %c0_4 = arith.constant 0 : index
    %2 = vector.load %arg5[%c0_3, %c0_4] : memref<3x32xf32, #tpu.memory_space<vmem>>, vector<1x32xf32>
    %c1 = arith.constant 1 : index
    %c0_5 = arith.constant 0 : index
    %3 = vector.load %arg5[%c1, %c0_5] : memref<3x32xf32, #tpu.memory_space<vmem>>, vector<1x32xf32>
    %c2 = arith.constant 2 : index
    %c0_6 = arith.constant 0 : index
    %4 = vector.load %arg5[%c2, %c0_6] : memref<3x32xf32, #tpu.memory_space<vmem>>, vector<1x32xf32>
    %5 = arith.truncf %0 : vector<8x32xf32> to vector<8x32xbf16>
    %c0_7 = arith.constant 0 : index
    %c0_8 = arith.constant 0 : index
    %6 = vector.load %arg2[%c0_7, %c0_8] : memref<32x64xbf16, #tpu.memory_space<vmem>>, vector<32x64xbf16>
    %cst = arith.constant dense<0.000000e+00> : vector<8x64xf32>
    %7 = tpu.matmul %5, %6, %cst {dimension_numbers = #tpu.dot_dimension_numbers<[1], [0], [0], [1], [0, 0, 1, 1], [], []>} : vector<8x32xbf16>, vector<32x64xbf16>, vector<8x64xf32> -> vector<8x64xf32>
    %8 = vector.broadcast %1 : vector<1x64xf32> to vector<8x64xf32>
    %9 = arith.addf %7, %8 : vector<8x64xf32>
    %cst_9 = arith.constant 0.000000e+00 : f32
    %10 = vector.broadcast %cst_9 : f32 to vector<8x64xf32>
    %11 = arith.cmpf oge, %9, %10 : vector<8x64xf32>
    %cst_10 = arith.constant 0.00999999977 : f32
    %12 = vector.broadcast %cst_10 : f32 to vector<8x64xf32>
    %13 = arith.mulf %12, %9 : vector<8x64xf32>
    %14 = arith.select %11, %9, %13 : vector<8x64xi1>, vector<8x64xf32>
    %15 = arith.truncf %14 : vector<8x64xf32> to vector<8x64xbf16>
    %c0_11 = arith.constant 0 : index
    %c0_12 = arith.constant 0 : index
    %16 = vector.load %arg3[%c0_11, %c0_12] : memref<64x32xbf16, #tpu.memory_space<vmem>>, vector<64x32xbf16>
    %cst_13 = arith.constant dense<0.000000e+00> : vector<8x32xf32>
    %17 = tpu.matmul %15, %16, %cst_13 {dimension_numbers = #tpu.dot_dimension_numbers<[1], [0], [0], [1], [0, 0, 1, 1], [], []>} : vector<8x64xbf16>, vector<64x32xbf16>, vector<8x32xf32> -> vector<8x32xf32>
    %18 = vector.broadcast %2 : vector<1x32xf32> to vector<8x32xf32>
    %19 = arith.addf %17, %18 : vector<8x32xf32>
    %20 = arith.addf %19, %0 : vector<8x32xf32>
    %cst_14 = arith.constant dense<0.000000e+00> : vector<8xf32>
    %21 = vector.multi_reduction <add>, %20, %cst_14 [1] : vector<8x32xf32> to vector<8xf32>
    %22 = vector.shape_cast %21 : vector<8xf32> to vector<8x1xf32>
    %cst_15 = arith.constant 3.125000e-02 : f32
    %23 = vector.broadcast %cst_15 : f32 to vector<8x1xf32>
    %24 = arith.mulf %22, %23 : vector<8x1xf32>
    %25 = vector.broadcast %24 : vector<8x1xf32> to vector<8x32xf32>
    %26 = arith.subf %20, %25 : vector<8x32xf32>
    %27 = arith.mulf %26, %26 : vector<8x32xf32>
    %cst_16 = arith.constant dense<0.000000e+00> : vector<8xf32>
    %28 = vector.multi_reduction <add>, %27, %cst_16 [1] : vector<8x32xf32> to vector<8xf32>
    %29 = vector.shape_cast %28 : vector<8xf32> to vector<8x1xf32>
    %cst_17 = arith.constant 3.125000e-02 : f32
    %30 = vector.broadcast %cst_17 : f32 to vector<8x1xf32>
    %31 = arith.mulf %29, %30 : vector<8x1xf32>
    %cst_18 = arith.constant 9.99999974E-6 : f32
    %32 = vector.broadcast %cst_18 : f32 to vector<8x1xf32>
    %33 = arith.addf %31, %32 : vector<8x1xf32>
    %34 = math.rsqrt %33 : vector<8x1xf32>
    %35 = vector.broadcast %34 : vector<8x1xf32> to vector<8x32xf32>
    %36 = arith.mulf %26, %35 : vector<8x32xf32>
    %37 = vector.broadcast %3 : vector<1x32xf32> to vector<8x32xf32>
    %38 = arith.mulf %36, %37 : vector<8x32xf32>
    %39 = vector.broadcast %4 : vector<1x32xf32> to vector<8x32xf32>
    %40 = arith.addf %38, %39 : vector<8x32xf32>
    %cst_19 = arith.constant 0.000000e+00 : f32
    %41 = vector.broadcast %cst_19 : f32 to vector<8x32xf32>
    %42 = arith.cmpf oge, %40, %41 : vector<8x32xf32>
    %cst_20 = arith.constant 0.00999999977 : f32
    %43 = vector.broadcast %cst_20 : f32 to vector<8x32xf32>
    %44 = arith.mulf %43, %40 : vector<8x32xf32>
    %45 = arith.select %42, %40, %44 : vector<8x32xi1>, vector<8x32xf32>
    %c0_21 = arith.constant 0 : index
    %c0_22 = arith.constant 0 : index
    %46 = vector.load %arg6[%c0_21, %c0_22] : memref<8x32xf32, #tpu.memory_space<vmem>>, vector<8x32xf32>
    tpu.vector_store %arg6[%c0_21, %c0_22], %45 {strides = array<i32>} : memref<8x32xf32, #tpu.memory_space<vmem>>, vector<8x32xf32>,
    return
  }
  func.func @transform_0(%arg0: i32) -> (i32, i32) {
    %c0_i32 = arith.constant 0 : i32
    %c0_i32_0 = arith.constant 0 : i32
    return %arg0, %c0_i32 : i32, i32
  }
  func.func @transform_1(%arg0: i32) -> (i32, i32) {
    %c0_i32 = arith.constant 0 : i32
    %c0_i32_0 = arith.constant 0 : i32
    %c0_i32_1 = arith.constant 0 : i32
    return %c0_i32, %c0_i32_0 : i32, i32
  }
  func.func @transform_2(%arg0: i32) -> (i32, i32) {
    %c0_i32 = arith.constant 0 : i32
    %c0_i32_0 = arith.constant 0 : i32
    %c0_i32_1 = arith.constant 0 : i32
    return %c0_i32, %c0_i32_0 : i32, i32
  }
  func.func @transform_3(%arg0: i32) -> (i32, i32) {
    %c0_i32 = arith.constant 0 : i32
    %c0_i32_0 = arith.constant 0 : i32
    %c0_i32_1 = arith.constant 0 : i32
    return %c0_i32, %c0_i32_0 : i32, i32
  }
  func.func @transform_4(%arg0: i32) -> (i32, i32) {
    %c0_i32 = arith.constant 0 : i32
    %c0_i32_0 = arith.constant 0 : i32
    %c0_i32_1 = arith.constant 0 : i32
    return %c0_i32, %c0_i32_0 : i32, i32
  }
  func.func @transform_5(%arg0: i32) -> (i32, i32) {
    %c0_i32 = arith.constant 0 : i32
    %c0_i32_0 = arith.constant 0 : i32
    return %arg0, %c0_i32 : i32, i32
  }
}

</mosaic_0001>

<bundles_post_ra>
// kernel: tpu_custom_call.1
= control target key start
LH: loop header
LB: loop body
LE: loop exit
PB: predicated region body
PF: predicated region fallthrough
CT: control target
= control target key end

     0   :  { %v295_v1 = vmov 0.0   ;;  %vm296_vm0 = vmmov 0   ;;  %vm50_vm1 = vcmask 261120   ;;  %s377_s0 = inlined_call_operand.vmem [shape: f32[8,32], index: 0, kind: input, shape index: {}]   ;;  %s378_s1 = inlined_call_operand.vmem [shape: bf16[32,64], index: 1, kind: input, shape index: {}]   ;;  %s379_s2 = inlined_call_operand.vmem [shape: bf16[64,32], index: 2, kind: input, shape index: {}]   ;;  %s380_s3 = inlined_call_operand.vmem [shape: f32[1,64], index: 3, kind: input, shape index: {}]   ;;  %s381_s4 = inlined_call_operand.vmem [shape: f32[3,32], index: 4, kind: input, shape index: {}]   ;;  %s382_s5 = inlined_call_operand.hbm [shape: f32[8,32], index: 5, kind: output, shape index: {}]  }
   0x1   :  { %v263_v0 = vld [vmem:[%s378_s1] sm:$0xff]   ;;  %240 = vmatprep.subr.bf16.mxu0 %v295_v1  ;;  %v264_v2 = vld [vmem:[%s378_s1 + $0x8] sm:$0xff]   ;;  %248 = vmatprep.subr.bf16.mxu1 %v295_v1 }
   0x2   :  { %241 = vmatpush3.bf16.msra.mxu0 %v263_v0  ;;  %244 = vmatprep.mubr.msk.bf16.mxu0 %vm296_vm0, %v295_v1  ;;  %v22_v3 = vld [vmem:[%s377_s0] sm:$0xff]  ;;  %v266_v5 = vld [vmem:[%s379_s2 + $0x8] sm:$0xff]  }
   0x3   :  { %242 = vmatprep.subr.bf16.mxu0 %v295_v1  ;;  %v265_v4 = vld [vmem:[%s379_s2] sm:$0xff]   ;;  %256 = vmatprep.mubr.msk.bf16.mxu1 %vm296_vm0, %v295_v1  ;;  %v27_v6 = vpack.c.bf16 %v22_v3, %v22_v3 }
   0x4   :  { %249 = vmatpush3.bf16.msra.mxu1 %v265_v4 }
   0x5   :  { %250 = vmatprep.subr.bf16.mxu1 %v295_v1 }
   0x6   :  { %243 = vmatpush3.bf16.msra.mxu0 %v264_v2 }
   0x7   :  { %10 = vsyncpa [#allocation3], 0  ;;  %v267_v7 = vld [vmem:[%s379_s2 + $0x10] sm:$0xff]   ;;  %v268_v8 = vld [vmem:[%s379_s2 + $0x18] sm:$0xff]   ;;  %vm134_vm3 = vcmask 523264   ;;  %s297_s11 = smov [#allocation2]  }
   0x8   :  { %251 = vmatpush3.bf16.msra.mxu1 %v266_v5  ;;  %v220_v9 = vld [vmem:[%s380_s3] ss:$0 sm:$0xff]  ;;  %v230_v35 = vld [vmem:[%s381_s4 + $0x1] ss:$0 sm:$0xff]  ;;  %v231_v37 = vld [vmem:[%s381_s4 + $0x2] ss:$0 sm:$0xff] }
   0x9   :  { %245 = vmatmul.mubr.msk.bf16.vlgmr.msra.gmra.mrb[0].mxu0 %vm50_vm1, %v27_v6  ;;  %252 = vmatprep.subr.bf16.mxu1 %v295_v1  ;;  %v224_v18 = vld [vmem:[%s381_s4] ss:$0 sm:$0xff]  ;;  %s212_s12 = sshll.u32 %s297_s11, 4  ;;  %s213_s12 = int_to_ptr.vmem [resolvable:$true] %s212_s12 }
   0xa   :  { %s271_s13 = scalar_lea.vmem %s213_s12, 128  ;;  %p276_p1 = scmp.lt.s32.totalorder %s213_s12, %s213_s12 }
   0xb   :  { %p272_p0 = scmp.ne.s32.totalorder %s213_s12, %s271_s13  ;;  %p277_p2 = scmp.lt.s32.totalorder %s271_s13, %s271_s13 }
   0xc   :  { %253 = vmatpush3.bf16.msra.mxu1 %v267_v7 }
   0xd   :  { %254 = vmatprep.subr.bf16.mxu1 %v295_v1  ;;  %p278_p3 = por %p277_p2, %p276_p1 }
   0xf   :  { %p279_p4 = pnand %p278_p3, %p272_p0 }
  0x10   :  { %255 = vmatpush3.bf16.msra.mxu1 %v268_v8 }
  0xdc   :  { %v88_v10 = vpop.f32.mrb[0].mxu0 }
  0xdd   :  { %v89_v11 = vadd.f32 %v220_v9, %v88_v10  ;;  %v246_v12 = vpop.f32.mrb[1].mxu0 }
  0xde   :  { %v91_v13 = vpop.f32.mrb[2].mxu0 }
  0xdf   :  { %vm94_vm2 = vcmp.ge.f32.partialorder %v89_v11, 0.0  ;;  %v95_v14 = vmul.f32 0.01, %v89_v11  ;;  %v247_v15 = vpop.f32.mrb[3].mxu0 }
  0xe1   :  { %v96_v16 = vsel %vm94_vm2, %v89_v11, %v95_v14 }
  0xe2   :  { %v97_v17 = vpack.c.bf16 %v96_v16, %v96_v16 }
  0xe4   :  { %257 = vmatmul.mubr.msk.bf16.vlgmr.msra.gmra.mrb[0].mxu1 %vm134_vm3, %v97_v17 }
 0x1b7   :  { %v172_v19 = vpop.f32.mrb[0].mxu1 }
 0x1b8   :  { %v173_v20 = vadd.f32 %v224_v18, %v172_v19  ;;  %v258_v21 = vpop.f32.mrb[1].mxu1 }
 0x1b9   :  { %v175_v22 = vpop.f32.mrb[2].mxu1 }
 0x1ba   :  { %v259_v23 = vpop.f32.mrb[3].mxu1  ;;  %v178_v24 = vadd.f32 %v173_v20, %v22_v3 }
 0x1bc   :  { %v179_v25 = vsel %vm50_vm1, %v178_v24, 0.0 }
 0x1bd   :  { %180 = vadd.xlane.f32.xlu0 %v179_v25 }
 0x24a   :  { %v181_v26 = vpop.xlane.xlu0 %180 }
 0x24b   :  { %v182_v27 = vmul.f32 0.03125, %v181_v26 }
 0x24d   :  { %v183_v28 = vsub.f32 %v178_v24, %v182_v27 }
 0x24f   :  { %v184_v29 = vmul.f32 %v183_v28, %v183_v28 }
 0x251   :  { %v185_v30 = vsel %vm50_vm1, %v184_v29, 0.0 }
 0x252   :  { %186 = vadd.xlane.f32.xlu0 %v185_v30 }
 0x2df   :  { %v187_v31 = vpop.xlane.xlu0 %186 }
 0x2e0   :  { %v188_v32 = vmul.f32 0.03125, %v187_v31 }
 0x2e2   :  { %v189_v33 = vadd.f32 1e-05, %v188_v32 }
 0x2e4   :  { %269 = vrsqrt.f32 %v189_v33 }
 0x2ee   :  { %v270_v34 = vpop.eup %269 }
 0x2ef   :  { %v191_v36 = vmul.f32 %v270_v34, %v183_v28 }
 0x2f1   :  { %v196_v38 = vmul.f32 %v230_v35, %v191_v36 }
 0x2f3   :  { %v201_v39 = vadd.f32 %v231_v37, %v196_v38 }
 0x2f5   :  { %vm202_vm4 = vcmp.ge.f32.partialorder %v201_v39, 0.0  ;;  %v203_v40 = vmul.f32 0.01, %v201_v39 }
 0x2f7   :  { %v204_v41 = vsel %vm202_vm4, %v201_v39, %v203_v40 }
 0x2f8   :  { %205 = vst.msk [vmem:[#allocation2] sm:$0xff] %vm50_vm1, %v204_v41 }
 0x2f9   :  { %282 = shalt.err (!%p279_p4)
}
 0x2fa   :  { %s283_s4 = scalar_lea.hbm %s382_s5, 128 }
 0x2fb   :  { %p284_p5 = scmp.ne.s32.totalorder %s382_s5, %s283_s4  ;;  %p287_p6 = scmp.lt.u32.totalorder %s283_s4, %s382_s5 }
 0x2fd   :  { %p289_p7 = pnand %p287_p6, %p284_p5 }
 0x2ff   :  { %292 = shalt.err (!%p289_p7)
}
 0x300   :  { %215 = dma.vmem_to_hbm [thread:$0]  %s213_s12, 128, %s382_s5, [#allocation3]  }
 0x301   :  { %293 = dma.done.wait [#allocation3], 128  }
 0x302   :  { %294 = vsyncadd [#allocation3], 4294967168 }
 0x303   :  { %219 = vsyncpa [#allocation3], 1 }

// kernel: tpu_custom_call.1
= control target key start
LH: loop header
LB: loop body
LE: loop exit
PB: predicated region body
PF: predicated region fallthrough
CT: control target
= control target key end

     0   :  { %v295_v1 = vmov 0.0   ;;  %vm296_vm0 = vmmov 0   ;;  %vm50_vm1 = vcmask 261120   ;;  %s377_s0 = inlined_call_operand.vmem [shape: f32[8,32], index: 0, kind: input, shape index: {}]   ;;  %s378_s1 = inlined_call_operand.vmem [shape: bf16[32,64], index: 1, kind: input, shape index: {}]   ;;  %s379_s2 = inlined_call_operand.vmem [shape: bf16[64,32], index: 2, kind: input, shape index: {}]   ;;  %s380_s3 = inlined_call_operand.vmem [shape: f32[1,64], index: 3, kind: input, shape index: {}]   ;;  %s381_s4 = inlined_call_operand.vmem [shape: f32[3,32], index: 4, kind: input, shape index: {}]   ;;  %s382_s5 = inlined_call_operand.hbm [shape: f32[8,32], index: 5, kind: output, shape index: {}]  }
   0x1   :  { %v263_v0 = vld [vmem:[%s378_s1] sm:$0xff]   ;;  %240 = vmatprep.subr.bf16.mxu0 %v295_v1  ;;  %v264_v2 = vld [vmem:[%s378_s1 + $0x8] sm:$0xff]   ;;  %248 = vmatprep.subr.bf16.mxu1 %v295_v1 }
   0x2   :  { %241 = vmatpush3.bf16.msra.mxu0 %v263_v0  ;;  %244 = vmatprep.mubr.msk.bf16.mxu0 %vm296_vm0, %v295_v1  ;;  %v22_v3 = vld [vmem:[%s377_s0] sm:$0xff]  ;;  %v266_v5 = vld [vmem:[%s379_s2 + $0x8] sm:$0xff]  }
   0x3   :  { %242 = vmatprep.subr.bf16.mxu0 %v295_v1  ;;  %v265_v4 = vld [vmem:[%s379_s2] sm:$0xff]   ;;  %256 = vmatprep.mubr.msk.bf16.mxu1 %vm296_vm0, %v295_v1  ;;  %v27_v6 = vpack.c.bf16 %v22_v3, %v22_v3 }
   0x4   :  { %249 = vmatpush3.bf16.msra.mxu1 %v265_v4 }
   0x5   :  { %250 = vmatprep.subr.bf16.mxu1 %v295_v1 }
   0x6   :  { %243 = vmatpush3.bf16.msra.mxu0 %v264_v2 }
   0x7   :  { %10 = vsyncpa [#allocation3], 0  ;;  %v267_v7 = vld [vmem:[%s379_s2 + $0x10] sm:$0xff]   ;;  %v268_v8 = vld [vmem:[%s379_s2 + $0x18] sm:$0xff]   ;;  %vm134_vm3 = vcmask 523264   ;;  %s297_s11 = smov [#allocation2]  }
   0x8   :  { %251 = vmatpush3.bf16.msra.mxu1 %v266_v5  ;;  %v220_v9 = vld [vmem:[%s380_s3] ss:$0 sm:$0xff]  ;;  %v230_v35 = vld [vmem:[%s381_s4 + $0x1] ss:$0 sm:$0xff]  ;;  %v231_v37 = vld [vmem:[%s381_s4 + $0x2] ss:$0 sm:$0xff] }
   0x9   :  { %245 = vmatmul.mubr.msk.bf16.vlgmr.msra.gmra.mrb[0].mxu0 %vm50_vm1, %v27_v6  ;;  %252 = vmatprep.subr.bf16.mxu1 %v295_v1  ;;  %v224_v18 = vld [vmem:[%s381_s4] ss:$0 sm:$0xff]  ;;  %s212_s12 = sshll.u32 %s297_s11, 4  ;;  %s213_s12 = int_to_ptr.vmem [resolvable:$true] %s212_s12 }
   0xa   :  { %s271_s13 = scalar_lea.vmem %s213_s12, 128  ;;  %p276_p1 = scmp.lt.s32.totalorder %s213_s12, %s213_s12 }
   0xb   :  { %p272_p0 = scmp.ne.s32.totalorder %s213_s12, %s271_s13  ;;  %p277_p2 = scmp.lt.s32.totalorder %s271_s13, %s271_s13 }
   0xc   :  { %253 = vmatpush3.bf16.msra.mxu1 %v267_v7 }
   0xd   :  { %254 = vmatprep.subr.bf16.mxu1 %v295_v1  ;;  %p278_p3 = por %p277_p2, %p276_p1 }
   0xf   :  { %p279_p4 = pnand %p278_p3, %p272_p0 }
  0x10   :  { %255 = vmatpush3.bf16.msra.mxu1 %v268_v8 }
  0xdc   :  { %v88_v10 = vpop.f32.mrb[0].mxu0 }
  0xdd   :  { %v89_v11 = vadd.f32 %v220_v9, %v88_v10  ;;  %v246_v12 = vpop.f32.mrb[1].mxu0 }
  0xde   :  { %v91_v13 = vpop.f32.mrb[2].mxu0 }
  0xdf   :  { %vm94_vm2 = vcmp.ge.f32.partialorder %v89_v11, 0.0  ;;  %v95_v14 = vmul.f32 0.01, %v89_v11  ;;  %v247_v15 = vpop.f32.mrb[3].mxu0 }
  0xe1   :  { %v96_v16 = vsel %vm94_vm2, %v89_v11, %v95_v14 }
  0xe2   :  { %v97_v17 = vpack.c.bf16 %v96_v16, %v96_v16 }
  0xe4   :  { %257 = vmatmul.mubr.msk.bf16.vlgmr.msra.gmra.mrb[0].mxu1 %vm134_vm3, %v97_v17 }
 0x1b7   :  { %v172_v19 = vpop.f32.mrb[0].mxu1 }
 0x1b8   :  { %v173_v20 = vadd.f32 %v224_v18, %v172_v19  ;;  %v258_v21 = vpop.f32.mrb[1].mxu1 }
 0x1b9   :  { %v175_v22 = vpop.f32.mrb[2].mxu1 }
 0x1ba   :  { %v259_v23 = vpop.f32.mrb[3].mxu1  ;;  %v178_v24 = vadd.f32 %v173_v20, %v22_v3 }
 0x1bc   :  { %v179_v25 = vsel %vm50_vm1, %v178_v24, 0.0 }
 0x1bd   :  { %180 = vadd.xlane.f32.xlu0 %v179_v25 }
 0x24a   :  { %v181_v26 = vpop.xlane.xlu0 %180 }
 0x24b   :  { %v182_v27 = vmul.f32 0.03125, %v181_v26 }
 0x24d   :  { %v183_v28 = vsub.f32 %v178_v24, %v182_v27 }
 0x24f   :  { %v184_v29 = vmul.f32 %v183_v28, %v183_v28 }
 0x251   :  { %v185_v30 = vsel %vm50_vm1, %v184_v29, 0.0 }
 0x252   :  { %186 = vadd.xlane.f32.xlu0 %v185_v30 }
 0x2df   :  { %v187_v31 = vpop.xlane.xlu0 %186 }
 0x2e0   :  { %v188_v32 = vmul.f32 0.03125, %v187_v31 }
 0x2e2   :  { %v189_v33 = vadd.f32 1e-05, %v188_v32 }
 0x2e4   :  { %269 = vrsqrt.f32 %v189_v33 }
 0x2ee   :  { %v270_v34 = vpop.eup %269 }
 0x2ef   :  { %v191_v36 = vmul.f32 %v270_v34, %v183_v28 }
 0x2f1   :  { %v196_v38 = vmul.f32 %v230_v35, %v191_v36 }
 0x2f3   :  { %v201_v39 = vadd.f32 %v231_v37, %v196_v38 }
 0x2f5   :  { %vm202_vm4 = vcmp.ge.f32.partialorder %v201_v39, 0.0  ;;  %v203_v40 = vmul.f32 0.01, %v201_v39 }
 0x2f7   :  { %v204_v41 = vsel %vm202_vm4, %v201_v39, %v203_v40 }
 0x2f8   :  { %205 = vst.msk [vmem:[#allocation2] sm:$0xff] %vm50_vm1, %v204_v41 }
 0x2f9   :  { %282 = shalt.err (!%p279_p4)
}
 0x2fa   :  { %s283_s4 = scalar_lea.hbm %s382_s5, 128 }
 0x2fb   :  { %p284_p5 = scmp.ne.s32.totalorder %s382_s5, %s283_s4  ;;  %p287_p6 = scmp.lt.u32.totalorder %s283_s4, %s382_s5 }
 0x2fd   :  { %p289_p7 = pnand %p287_p6, %p284_p5 }
 0x2ff   :  { %292 = shalt.err (!%p289_p7)
}
 0x300   :  { %215 = dma.vmem_to_hbm [thread:$0]  %s213_s12, 128, %s382_s5, [#allocation3]  }
 0x301   :  { %293 = dma.done.wait [#allocation3], 128  }
 0x302   :  { %294 = vsyncadd [#allocation3], 4294967168 }
 0x303   :  { %219 = vsyncpa [#allocation3], 1 }

</bundles_post_ra>
